<compile_context>
chip_gen: v6e
topology: v6e:2x2x1
jax: 0.10.0
libtpu: 0.0.40
codegen_flags: <defaults>
</compile_context>

<pallas_src>
import jax
import jax.numpy as jnp
from jax.experimental import pallas as pl
from jax.experimental.pallas import tpu as pltpu

_NPAD = 128  # lane-dense width for the padded final-layer matmul


def _round_up(x, m):
    return ((x + m - 1) // m) * m


def _num_tensorcores():
    # v7x has 2 TensorCores per chip; v5e/v6e have 1. device_kind is a plain string,
    # so this probe never affects lowering.
    try:
        kind = jax.devices()[0].device_kind.lower()
    except Exception:
        return 1
    return 2 if "7" in kind else 1


def _tile_rows(B, tb, n_cores):
    # MXU-aligned tile (multiple of 256 -> also a multiple of 128 for v5e), >= 256.
    tb_eff = max(256, _round_up(int(tb), 256))
    if n_cores > 1 and B >= 2 * 256:
        # Dual-TC (v7x): guarantee >=2 grid steps of >=256 aligned rows so both cores work.
        tb_eff = min(tb_eff, _round_up(pl.cdiv(B, n_cores), 256))
    if B <= tb_eff:
        # Small/medium batch: one grid step covering the full (possibly ragged) batch.
        tb_eff = B
    return tb_eff


def _mlp_kernel(x_ref, w1_ref, b1_ref, w2_ref, b2_ref,
                w3_ref, b3_ref, w4_ref, b4_ref, o_ref):
    cdt = w1_ref.dtype  # MXU compute dtype (bf16 by default); accumulation is always f32

    def hidden(h, w_ref, b_ref):
        y = jnp.dot(h, w_ref[...], preferred_element_type=jnp.float32) + b_ref[...]
        # Keep the materialized inter-layer activation in the compute dtype: the next
        # dot would cast to cdt anyway, so accuracy is unchanged but VMEM/ld-st halves.
        return jnp.maximum(y, 0.0).astype(cdt)

    h = hidden(x_ref[...].astype(cdt), w1_ref, b1_ref)   # in-kernel cast of f32 x
    h = hidden(h, w2_ref, b2_ref)
    h = hidden(h, w3_ref, b3_ref)
    # Final layer: W is lane-padded (256, 128) so the matmul stays lane-dense; only
    # column 0 is real. Sigmoid is applied to that single column and the kernel writes
    # a (tb, 1) output block.
    y4 = jnp.dot(h, w4_ref[...], preferred_element_type=jnp.float32) + b4_ref[...]
    o_ref[...] = jax.nn.sigmoid(y4[:, :1]).astype(o_ref.dtype)


def prepare_params(params, *, use_bf16=True):
    """One-time prep (hoisted out of the forward): weights stored (in, out) in the MXU
    compute dtype, biases in f32, final Linear(256, 1) zero-padded to 128 lanes."""
    (w1, b1), (w2, b2), (w3, b3), (w4, b4) = params
    wdt = jnp.bfloat16 if use_bf16 else jnp.float32
    w4p = jnp.zeros((256, _NPAD), wdt).at[:, :1].set(w4.astype(wdt))
    b4p = jnp.zeros((1, _NPAD), jnp.float32).at[:, :1].set(
        jnp.asarray(b4, jnp.float32).reshape(1, 1))
    return (w1.astype(wdt), jnp.asarray(b1, jnp.float32).reshape(1, 256),
            w2.astype(wdt), jnp.asarray(b2, jnp.float32).reshape(1, 256),
            w3.astype(wdt), jnp.asarray(b3, jnp.float32).reshape(1, 256),
            w4p, b4p)


def local_dis_forward(x, prepared, *, tb=2048):
    """x: [B, 512] float32 -> [B, 1] float32 sigmoid probabilities."""
    w1, b1, w2, b2, w3, b3, w4p, b4p = prepared
    B, D_in = x.shape
    assert D_in == 512
    x = x.astype(jnp.float32)   # f32 straight into the kernel; bf16 cast is in-kernel

    tb_eff = _tile_rows(B, tb, _num_tensorcores())
    grid = (pl.cdiv(B, tb_eff),)

    def bcast(shape):
        # Same block for every batch tile -> weights/biases stay VMEM-resident.
        return pl.BlockSpec(shape, lambda i: (0, 0))

    param_bytes = sum(a.size * a.dtype.itemsize for a in prepared)
    flops = 2 * B * (512 * 256 + 256 * 256 + 256 * 256 + 256 * _NPAD)
    cost = pl.CostEstimate(
        flops=flops,
        transcendentals=B,  # one sigmoid per output scalar
        bytes_accessed=x.size * x.dtype.itemsize + param_bytes + B * 4)

    # Generation-safe VMEM budget: enough for the chosen tile, capped below v7x's 64 MiB.
    vmem_est = (2 * tb_eff * 512 * 4          # double-buffered f32 x tile
                + 2 * param_bytes             # resident weights/biases (double-buffered)
                + 2 * tb_eff * 4              # output tile
                + 4 * tb_eff * 256 * 4)       # in-kernel activations / f32 accum headroom
    vmem_limit = int(min(48 * 1024 * 1024, max(32 * 1024 * 1024, vmem_est * 5 // 4)))

    out = pl.pallas_call(
        _mlp_kernel,
        out_shape=jax.ShapeDtypeStruct((B, 1), jnp.float32),
        grid_spec=pltpu.PrefetchScalarGridSpec(
            num_scalar_prefetch=0,
            grid=grid,
            in_specs=[
                pl.BlockSpec((tb_eff, 512), lambda i: (i, 0)),   # x tile (f32 in HBM)
                bcast((512, 256)), bcast((1, 256)),              # fc1
                bcast((256, 256)), bcast((1, 256)),              # fc2
                bcast((256, 256)), bcast((1, 256)),              # fc3
                bcast((256, _NPAD)), bcast((1, _NPAD)),          # fc4 (lane-padded)
            ],
            out_specs=pl.BlockSpec((tb_eff, 1), lambda i: (i, 0)),
        ),
        compiler_params=pltpu.CompilerParams(
            dimension_semantics=("parallel",),
            vmem_limit_bytes=vmem_limit),
        cost_estimate=cost,
    )(x, w1, b1, w2, b2, w3, b3, w4p, b4p)
    return out


def init_params(key):
    """Deterministic synthetic init matching nn.Linear shapes (stored transposed)."""
    dims = [(512, 256), (256, 256), (256, 256), (256, 1)]
    params = []
    for fan_in, fan_out in dims:
        key, kw, kb = jax.random.split(key, 3)
        bound = 1.0 / jnp.sqrt(fan_in)
        w = jax.random.uniform(kw, (fan_in, fan_out), jnp.float32, -bound, bound)
        b = jax.random.uniform(kb, (1, fan_out), jnp.float32, -bound, bound)
        params.append((w, b))
    return params


def _reference(x, params):
    h = x
    for i, (w, b) in enumerate(params):
        h = h @ w + b
        if i < 3:
            h = jnp.maximum(h, 0.0)
    return jax.nn.sigmoid(h)


if __name__ == "__main__":
    key = jax.random.PRNGKey(0)
    key, kx = jax.random.split(key)
    B = 8
    x = jax.random.normal(kx, (B, 512), jnp.float32)
    params = init_params(key)
    ref = _reference(x, params)

    # Exact-f32 path: tight check against the pure-JAX reference.
    prep_f32 = prepare_params(params, use_bf16=False)
    out_f32 = jax.block_until_ready(local_dis_forward(x, prep_f32))
    assert out_f32.shape == (B, 1)
    assert jnp.allclose(out_f32, ref, atol=1e-5, rtol=1e-5)

    # Default bf16-MXU path (bf16 operands, f32 accumulation): looser tolerance.
    prep_bf16 = prepare_params(params, use_bf16=True)
    out_bf16 = jax.block_until_ready(local_dis_forward(x, prep_bf16))
    assert out_bf16.shape == (B, 1)
    assert jnp.allclose(out_bf16, ref, atol=3e-2, rtol=3e-2)

    # Ragged multi-step path: grid of 2 with a clipped boundary block (no jnp.pad).
    B2 = 300
    x2 = jax.random.normal(jax.random.PRNGKey(1), (B2, 512), jnp.float32)
    out2 = jax.block_until_ready(local_dis_forward(x2, prep_f32, tb=256))
    assert out2.shape == (B2, 1)
    assert jnp.allclose(out2, _reference(x2, params), atol=1e-5, rtol=1e-5)

    print("KERNEL_OK")
</pallas_src>

<mosaic_0001>
module attributes {stable_mosaic.version = 11 : i64} {
  func.func @_mlp_kernel(%arg0: i32, %arg1: memref<8x512xf32, #tpu.memory_space<vmem>>, %arg2: memref<512x256xf32, #tpu.memory_space<vmem>>, %arg3: memref<1x256xf32, #tpu.memory_space<vmem>>, %arg4: memref<256x256xf32, #tpu.memory_space<vmem>>, %arg5: memref<1x256xf32, #tpu.memory_space<vmem>>, %arg6: memref<256x256xf32, #tpu.memory_space<vmem>>, %arg7: memref<1x256xf32, #tpu.memory_space<vmem>>, %arg8: memref<256x128xf32, #tpu.memory_space<vmem>>, %arg9: memref<1x128xf32, #tpu.memory_space<vmem>>, %arg10: memref<8x1xf32, #tpu.memory_space<vmem>>) attributes {dimension_semantics = [#tpu.dimension_semantics<parallel>], iteration_bounds = array<i64: 1>, scalar_prefetch = 0 : i64, scratch_operands = 0 : i64, tpu.core_type = #tpu.core_type<tc>, window_params = [{transform_indices = @transform_0, window_bounds = array<i64: 8, 512>}, {pipeline_mode = #tpu.pipeline_mode<synchronous>, transform_indices = @transform_1, window_bounds = array<i64: 512, 256>}, {pipeline_mode = #tpu.pipeline_mode<synchronous>, transform_indices = @transform_2, window_bounds = array<i64: 1, 256>}, {pipeline_mode = #tpu.pipeline_mode<synchronous>, transform_indices = @transform_3, window_bounds = array<i64: 256, 256>}, {pipeline_mode = #tpu.pipeline_mode<synchronous>, transform_indices = @transform_4, window_bounds = array<i64: 1, 256>}, {pipeline_mode = #tpu.pipeline_mode<synchronous>, transform_indices = @transform_5, window_bounds = array<i64: 256, 256>}, {pipeline_mode = #tpu.pipeline_mode<synchronous>, transform_indices = @transform_6, window_bounds = array<i64: 1, 256>}, {pipeline_mode = #tpu.pipeline_mode<synchronous>, transform_indices = @transform_7, window_bounds = array<i64: 256, 128>}, {pipeline_mode = #tpu.pipeline_mode<synchronous>, transform_indices = @transform_8, window_bounds = array<i64: 1, 128>}, {transform_indices = @transform_9, window_bounds = array<i64: 8, 1>}]} {
    %c0 = arith.constant 0 : index
    %c0_0 = arith.constant 0 : index
    %0 = vector.load %arg1[%c0, %c0_0] : memref<8x512xf32, #tpu.memory_space<vmem>>, vector<8x512xf32>
    %c0_1 = arith.constant 0 : index
    %c0_2 = arith.constant 0 : index
    %1 = vector.load %arg2[%c0_1, %c0_2] : memref<512x256xf32, #tpu.memory_space<vmem>>, vector<512x256xf32>
    %cst = arith.constant dense<0.000000e+00> : vector<8x256xf32>
    %2 = tpu.matmul %0, %1, %cst {dimension_numbers = #tpu.dot_dimension_numbers<[1], [0], [0], [1], [0, 0, 1, 1], [], []>} : vector<8x512xf32>, vector<512x256xf32>, vector<8x256xf32> -> vector<8x256xf32>
    %c0_3 = arith.constant 0 : index
    %c0_4 = arith.constant 0 : index
    %3 = vector.load %arg3[%c0_3, %c0_4] : memref<1x256xf32, #tpu.memory_space<vmem>>, vector<1x256xf32>
    %4 = vector.broadcast %3 : vector<1x256xf32> to vector<8x256xf32>
    %5 = arith.addf %2, %4 : vector<8x256xf32>
    %cst_5 = arith.constant 0.000000e+00 : f32
    %6 = vector.broadcast %cst_5 : f32 to vector<8x256xf32>
    %7 = arith.maximumf %5, %6 : vector<8x256xf32>
    %c0_6 = arith.constant 0 : index
    %c0_7 = arith.constant 0 : index
    %8 = vector.load %arg4[%c0_6, %c0_7] : memref<256x256xf32, #tpu.memory_space<vmem>>, vector<256x256xf32>
    %cst_8 = arith.constant dense<0.000000e+00> : vector<8x256xf32>
    %9 = tpu.matmul %7, %8, %cst_8 {dimension_numbers = #tpu.dot_dimension_numbers<[1], [0], [0], [1], [0, 0, 1, 1], [], []>} : vector<8x256xf32>, vector<256x256xf32>, vector<8x256xf32> -> vector<8x256xf32>
    %c0_9 = arith.constant 0 : index
    %c0_10 = arith.constant 0 : index
    %10 = vector.load %arg5[%c0_9, %c0_10] : memref<1x256xf32, #tpu.memory_space<vmem>>, vector<1x256xf32>
    %11 = vector.broadcast %10 : vector<1x256xf32> to vector<8x256xf32>
    %12 = arith.addf %9, %11 : vector<8x256xf32>
    %cst_11 = arith.constant 0.000000e+00 : f32
    %13 = vector.broadcast %cst_11 : f32 to vector<8x256xf32>
    %14 = arith.maximumf %12, %13 : vector<8x256xf32>
    %c0_12 = arith.constant 0 : index
    %c0_13 = arith.constant 0 : index
    %15 = vector.load %arg6[%c0_12, %c0_13] : memref<256x256xf32, #tpu.memory_space<vmem>>, vector<256x256xf32>
    %cst_14 = arith.constant dense<0.000000e+00> : vector<8x256xf32>
    %16 = tpu.matmul %14, %15, %cst_14 {dimension_numbers = #tpu.dot_dimension_numbers<[1], [0], [0], [1], [0, 0, 1, 1], [], []>} : vector<8x256xf32>, vector<256x256xf32>, vector<8x256xf32> -> vector<8x256xf32>
    %c0_15 = arith.constant 0 : index
    %c0_16 = arith.constant 0 : index
    %17 = vector.load %arg7[%c0_15, %c0_16] : memref<1x256xf32, #tpu.memory_space<vmem>>, vector<1x256xf32>
    %18 = vector.broadcast %17 : vector<1x256xf32> to vector<8x256xf32>
    %19 = arith.addf %16, %18 : vector<8x256xf32>
    %cst_17 = arith.constant 0.000000e+00 : f32
    %20 = vector.broadcast %cst_17 : f32 to vector<8x256xf32>
    %21 = arith.maximumf %19, %20 : vector<8x256xf32>
    %c0_18 = arith.constant 0 : index
    %c0_19 = arith.constant 0 : index
    %22 = vector.load %arg8[%c0_18, %c0_19] : memref<256x128xf32, #tpu.memory_space<vmem>>, vector<256x128xf32>
    %cst_20 = arith.constant dense<0.000000e+00> : vector<8x128xf32>
    %23 = tpu.matmul %21, %22, %cst_20 {dimension_numbers = #tpu.dot_dimension_numbers<[1], [0], [0], [1], [0, 0, 1, 1], [], []>} : vector<8x256xf32>, vector<256x128xf32>, vector<8x128xf32> -> vector<8x128xf32>
    %c0_21 = arith.constant 0 : index
    %c0_22 = arith.constant 0 : index
    %24 = vector.load %arg9[%c0_21, %c0_22] : memref<1x128xf32, #tpu.memory_space<vmem>>, vector<1x128xf32>
    %25 = vector.broadcast %24 : vector<1x128xf32> to vector<8x128xf32>
    %26 = arith.addf %23, %25 : vector<8x128xf32>
    %27 = vector.extract_strided_slice %26 {offsets = [0, 0], sizes = [8, 1], strides = [1, 1]} : vector<8x128xf32> to vector<8x1xf32>
    %28 = arith.negf %27 : vector<8x1xf32>
    %29 = math.exp %28 : vector<8x1xf32>
    %cst_23 = arith.constant 1.000000e+00 : f32
    %30 = vector.broadcast %cst_23 : f32 to vector<8x1xf32>
    %31 = arith.addf %30, %29 : vector<8x1xf32>
    %32 = arith.divf %30, %31 : vector<8x1xf32>
    %c0_24 = arith.constant 0 : index
    %c0_25 = arith.constant 0 : index
    %33 = vector.load %arg10[%c0_24, %c0_25] : memref<8x1xf32, #tpu.memory_space<vmem>>, vector<8x1xf32>
    tpu.vector_store %arg10[%c0_24, %c0_25], %32 {strides = array<i32>} : memref<8x1xf32, #tpu.memory_space<vmem>>, vector<8x1xf32>,
    return
  }
  func.func @transform_0(%arg0: i32) -> (i32, i32) {
    %c0_i32 = arith.constant 0 : i32
    %c0_i32_0 = arith.constant 0 : i32
    return %arg0, %c0_i32 : i32, i32
  }
  func.func @transform_1(%arg0: i32) -> (i32, i32) {
    %c0_i32 = arith.constant 0 : i32
    %c0_i32_0 = arith.constant 0 : i32
    %c0_i32_1 = arith.constant 0 : i32
    return %c0_i32, %c0_i32_0 : i32, i32
  }
  func.func @transform_2(%arg0: i32) -> (i32, i32) {
    %c0_i32 = arith.constant 0 : i32
    %c0_i32_0 = arith.constant 0 : i32
    %c0_i32_1 = arith.constant 0 : i32
    return %c0_i32, %c0_i32_0 : i32, i32
  }
  func.func @transform_3(%arg0: i32) -> (i32, i32) {
    %c0_i32 = arith.constant 0 : i32
    %c0_i32_0 = arith.constant 0 : i32
    %c0_i32_1 = arith.constant 0 : i32
    return %c0_i32, %c0_i32_0 : i32, i32
  }
  func.func @transform_4(%arg0: i32) -> (i32, i32) {
    %c0_i32 = arith.constant 0 : i32
    %c0_i32_0 = arith.constant 0 : i32
    %c0_i32_1 = arith.constant 0 : i32
    return %c0_i32, %c0_i32_0 : i32, i32
  }
  func.func @transform_5(%arg0: i32) -> (i32, i32) {
    %c0_i32 = arith.constant 0 : i32
    %c0_i32_0 = arith.constant 0 : i32
    %c0_i32_1 = arith.constant 0 : i32
    return %c0_i32, %c0_i32_0 : i32, i32
  }
  func.func @transform_6(%arg0: i32) -> (i32, i32) {
    %c0_i32 = arith.constant 0 : i32
    %c0_i32_0 = arith.constant 0 : i32
    %c0_i32_1 = arith.constant 0 : i32
    return %c0_i32, %c0_i32_0 : i32, i32
  }
  func.func @transform_7(%arg0: i32) -> (i32, i32) {
    %c0_i32 = arith.constant 0 : i32
    %c0_i32_0 = arith.constant 0 : i32
    %c0_i32_1 = arith.constant 0 : i32
    return %c0_i32, %c0_i32_0 : i32, i32
  }
  func.func @transform_8(%arg0: i32) -> (i32, i32) {
    %c0_i32 = arith.constant 0 : i32
    %c0_i32_0 = arith.constant 0 : i32
    %c0_i32_1 = arith.constant 0 : i32
    return %c0_i32, %c0_i32_0 : i32, i32
  }
  func.func @transform_9(%arg0: i32) -> (i32, i32) {
    %c0_i32 = arith.constant 0 : i32
    %c0_i32_0 = arith.constant 0 : i32
    return %arg0, %c0_i32 : i32, i32
  }
}

</mosaic_0001>

<bundles_post_ra>
// kernel: tpu_custom_call.1
= control target key start
LH: loop header
LB: loop body
LE: loop exit
PB: predicated region body
PF: predicated region fallthrough
CT: control target
= control target key end

     0   :  { %14 = vsyncpa [#allocation3], 0  ;;  %s1072_s0 = inlined_call_operand.hbm [shape: f32[8,512], index: 0, kind: input, shape index: {}]   ;;  %s1073_s1 = inlined_call_operand.hbm [shape: f32[512,256], index: 1, kind: input, shape index: {}]   ;;  %s1074_s2 = inlined_call_operand.vmem [shape: f32[1,256], index: 2, kind: input, shape index: {}]   ;;  %s1075_s3 = inlined_call_operand.hbm [shape: f32[256,256], index: 3, kind: input, shape index: {}]   ;;  %s1076_s4 = inlined_call_operand.vmem [shape: f32[1,256], index: 4, kind: input, shape index: {}]   ;;  %s1077_s5 = inlined_call_operand.hbm [shape: f32[256,256], index: 5, kind: input, shape index: {}]   ;;  %s1078_s6 = inlined_call_operand.vmem [shape: f32[1,256], index: 6, kind: input, shape index: {}]   ;;  %s1079_s7 = inlined_call_operand.hbm [shape: f32[256,128], index: 7, kind: input, shape index: {}]   ;;  %s1080_s8 = inlined_call_operand.vmem [shape: f32[1,128], index: 8, kind: input, shape index: {}]   ;;  %s1081_s9 = inlined_call_operand.vmem [shape: f32[8,1], index: 9, kind: output, shape index: {}]  }
   0x1   :  { %15 = vsyncpa [#allocation5], 0 }
   0x2   :  { %16 = vsyncpa [#allocation8], 0  ;;  %s964_s30 = smov [#allocation4]  }
   0x3   :  { %s32_s10 = sshll.u32 %s964_s30, 4  ;;  %s33_s10 = int_to_ptr.vmem [resolvable:$true] %s32_s10 }
   0x4   :  { %s866_s11 = scalar_lea.vmem %s33_s10, 16384  ;;  %p871_p1 = scmp.lt.s32.totalorder %s33_s10, %s33_s10 }
   0x5   :  { %p867_p0 = scmp.ne.s32.totalorder %s33_s10, %s866_s11  ;;  %p872_p2 = scmp.lt.s32.totalorder %s866_s11, %s866_s11 }
   0x7   :  { %p873_p3 = por %p872_p2, %p871_p1 }
   0x9   :  { %p874_p4 = pnand %p873_p3, %p867_p0 }
   0xb   :  { %877 = shalt.err (!%p874_p4)
}
   0xc   :  { %s965_s12 = smov 256   ;;  %s966_s13 = smov 16  }
   0xd   :  { %38 = dma.hbm_to_vmem [thread:$0]  %s1073_s1, 16384, %s33_s10, [#allocation5], %s965_s12, %s965_s12, %s966_s13  }
   0xe   :  { %s967_s16 = smov [#allocation7]   ;;  %s968_s18 = smov [#allocation2]  }
   0xf   :  { %s60_s17 = sshll.u32 %s967_s16, 4  ;;  %s23_s19 = sshll.u32 %s968_s18, 4  ;;  %s61_s17 = int_to_ptr.vmem [resolvable:$true] %s60_s17  ;;  %s24_s19 = int_to_ptr.vmem [resolvable:$true] %s23_s19 }
  0x10   :  { %s886_s20 = scalar_lea.vmem %s61_s17, 8192  ;;  %p891_p6 = scmp.lt.s32.totalorder %s61_s17, %s61_s17 }
  0x11   :  { %p887_p5 = scmp.ne.s32.totalorder %s61_s17, %s886_s20  ;;  %p892_p7 = scmp.lt.s32.totalorder %s886_s20, %s886_s20 }
  0x13   :  { %p893_p8 = por %p892_p7, %p891_p6 }
  0x15   :  { %p894_p9 = pnand %p893_p8, %p887_p5 }
  0x17   :  { %897 = shalt.err (!%p894_p9)
}
  0x18   :  { %66 = dma.hbm_to_vmem [thread:$0]  %s1077_s5, 8192, %s61_s17, [#allocation8], %s965_s12, %s965_s12, %s966_s13  }
  0x19   :  { %s906_s1 = scalar_lea.vmem %s24_s19, 512  ;;  %p911_p11 = scmp.lt.s32.totalorder %s24_s19, %s24_s19 }
  0x1a   :  { %p907_p10 = scmp.ne.s32.totalorder %s24_s19, %s906_s1  ;;  %p912_p12 = scmp.lt.s32.totalorder %s906_s1, %s906_s1 }
  0x1c   :  { %p913_p13 = por %p912_p12, %p911_p11 }
  0x1e   :  { %p914_p0 = pnand %p913_p13, %p907_p10 }
  0x20   :  { %917 = shalt.err (!%p914_p0)
}
  0x21   :  { %26 = dma.hbm_to_vmem [thread:$0]  %s1072_s0, 512, %s24_s19, [#allocation3]  }
  0x22   :  { %s969_s25 = smov [#allocation6]   ;;  %s970_s27 = smov [#allocation9]  }
  0x23   :  { %s46_s26 = sshll.u32 %s969_s25, 4  ;;  %s74_s28 = sshll.u32 %s970_s27, 4  ;;  %s47_s26 = int_to_ptr.vmem [resolvable:$true] %s46_s26  ;;  %s75_s28 = int_to_ptr.vmem [resolvable:$true] %s74_s28 }
  0x24   :  { %s926_s29 = scalar_lea.vmem %s47_s26, 8192  ;;  %p931_p2 = scmp.lt.s32.totalorder %s47_s26, %s47_s26 }
  0x25   :  { %p927_p1 = scmp.ne.s32.totalorder %s47_s26, %s926_s29  ;;  %p932_p3 = scmp.lt.s32.totalorder %s926_s29, %s926_s29 }
  0x27   :  { %p933_p4 = por %p932_p3, %p931_p2 }
  0x29   :  { %p934_p5 = pnand %p933_p4, %p927_p1 }
  0x2b   :  { %937 = shalt.err (!%p934_p5)
}
  0x2c   :  { %52 = dma.hbm_to_vmem [thread:$0]  %s1075_s3, 8192, %s47_s26, [#allocation5], %s965_s12, %s965_s12, %s966_s13  }
  0x2d   :  { %s946_s0 = scalar_lea.vmem %s75_s28, 4096  ;;  %p951_p7 = scmp.lt.s32.totalorder %s75_s28, %s75_s28 }
  0x2e   :  { %p947_p6 = scmp.ne.s32.totalorder %s75_s28, %s946_s0  ;;  %p952_p8 = scmp.lt.s32.totalorder %s946_s0, %s946_s0 }
  0x30   :  { %p953_p9 = por %p952_p8, %p951_p7 }
  0x32   :  { %p954_p10 = pnand %p953_p9, %p947_p6 }
  0x34   :  { %957 = shalt.err (!%p954_p10)
}
  0x35   :  { %s971_s10 = smov 128   ;;  %s972_s11 = smov 8  }
  0x36   :  { %80 = dma.hbm_to_vmem [thread:$0]  %s1079_s7, 4096, %s75_s28, [#allocation8], %s971_s10, %s971_s10, %s972_s11  }
  0x37   :  { %958 = dma.done.wait [#allocation3], 512  }
  0x38   :  { %959 = vsyncadd [#allocation3], 4294966784 }
  0x39   :  { %960 = dma.done.wait [#allocation5], 24576  }
  0x3a   :  { %961 = vsyncadd [#allocation5], 4294942720 }
  0x3b   :  { %962 = dma.done.wait [#allocation8], 12288  }
  0x3c   :  { %963 = vsyncadd [#allocation8], 4294955008  ;;  %v133_v0 = vld [vmem:[#allocation4 + $0xf8] sm:$0xff]  ;;  %v132_v2 = vld [vmem:[#allocation4 + $0xf0] sm:$0xff]  ;;  %vm799_vm0 = vcmask 7168  }
  0x3d   :  { %v197_v1 = vld [vmem:[#allocation4 + $0x2f8] sm:$0xff]  ;;  %242 = vmatprep.subr.mxu0 %v133_v0  ;;  %v196_v3 = vld [vmem:[#allocation4 + $0x2f0] sm:$0xff]  ;;  %v131_v4 = vld [vmem:[#allocation4 + $0xe8] sm:$0xff] }
  0x3e   :  { %313 = vmatprep.subr.mxu1 %v197_v1  ;;  %v195_v5 = vld [vmem:[#allocation4 + $0x2e8] sm:$0xff]  ;;  %243 = vmatpush1.msra.mxu0 %v132_v2  ;;  %v130_v6 = vld [vmem:[#allocation4 + $0xe0] sm:$0xff]  ;;  %v129_v8 = vld [vmem:[#allocation4 + $0xd8] sm:$0xff] }
  0x3f   :  { %314 = vmatpush1.msra.mxu1 %v196_v3  ;;  %v194_v7 = vld [vmem:[#allocation4 + $0x2e0] sm:$0xff]  ;;  %244 = vmatprep.subr.mxu0 %v131_v4  ;;  %v193_v9 = vld [vmem:[#allocation4 + $0x2d8] sm:$0xff]  ;;  %v128_v10 = vld [vmem:[#allocation4 + $0xd0] sm:$0xff] }
  0x40   :  { %315 = vmatprep.subr.mxu1 %v195_v5  ;;  %v192_v11 = vld [vmem:[#allocation4 + $0x2d0] sm:$0xff]  ;;  %245 = vmatpush1.msra.mxu0 %v130_v6  ;;  %v127_v12 = vld [vmem:[#allocation4 + $0xc8] sm:$0xff]  ;;  %v126_v14 = vld [vmem:[#allocation4 + $0xc0] sm:$0xff] }
  0x41   :  { %316 = vmatpush1.msra.mxu1 %v194_v7  ;;  %v191_v13 = vld [vmem:[#allocation4 + $0x2c8] sm:$0xff]  ;;  %246 = vmatprep.subr.mxu0 %v129_v8  ;;  %v190_v15 = vld [vmem:[#allocation4 + $0x2c0] sm:$0xff]  ;;  %v125_v16 = vld [vmem:[#allocation4 + $0xb8] sm:$0xff] }
  0x42   :  { %317 = vmatprep.subr.mxu1 %v193_v9  ;;  %247 = vmatpush1.msra.mxu0 %v128_v10  ;;  %v189_v17 = vld [vmem:[#allocation4 + $0x2b8] sm:$0xff]  ;;  %v124_v18 = vld [vmem:[#allocation4 + $0xb0] sm:$0xff]  ;;  %v123_v20 = vld [vmem:[#allocation4 + $0xa8] sm:$0xff] }
  0x43   :  { %318 = vmatpush1.msra.mxu1 %v192_v11  ;;  %248 = vmatprep.subr.mxu0 %v127_v12  ;;  %v188_v19 = vld [vmem:[#allocation4 + $0x2b0] sm:$0xff]  ;;  %v187_v21 = vld [vmem:[#allocation4 + $0x2a8] sm:$0xff]  ;;  %v122_v22 = vld [vmem:[#allocation4 + $0xa0] sm:$0xff] }
  0x44   :  { %319 = vmatprep.subr.mxu1 %v191_v13  ;;  %249 = vmatpush1.msra.mxu0 %v126_v14  ;;  %v186_v23 = vld [vmem:[#allocation4 + $0x2a0] sm:$0xff]  ;;  %v121_v24 = vld [vmem:[#allocation4 + $0x98] sm:$0xff]  ;;  %v120_v26 = vld [vmem:[#allocation4 + $0x90] sm:$0xff] }
  0x45   :  { %320 = vmatpush1.msra.mxu1 %v190_v15  ;;  %250 = vmatprep.subr.mxu0 %v125_v16  ;;  %v185_v25 = vld [vmem:[#allocation4 + $0x298] sm:$0xff]  ;;  %v184_v27 = vld [vmem:[#allocation4 + $0x290] sm:$0xff]  ;;  %v119_v28 = vld [vmem:[#allocation4 + $0x88] sm:$0xff] }
  0x46   :  { %321 = vmatprep.subr.mxu1 %v189_v17  ;;  %251 = vmatpush1.msra.mxu0 %v124_v18  ;;  %v183_v29 = vld [vmem:[#allocation4 + $0x288] sm:$0xff]  ;;  %v118_v30 = vld [vmem:[#allocation4 + $0x80] sm:$0xff]  ;;  %v117_v32 = vld [vmem:[#allocation4 + $0x78] sm:$0xff] }
  0x47   :  { %322 = vmatpush1.msra.mxu1 %v188_v19  ;;  %252 = vmatprep.subr.mxu0 %v123_v20  ;;  %v182_v31 = vld [vmem:[#allocation4 + $0x280] sm:$0xff]  ;;  %v181_v33 = vld [vmem:[#allocation4 + $0x278] sm:$0xff]  ;;  %v116_v34 = vld [vmem:[#allocation4 + $0x70] sm:$0xff] }
  0x48   :  { %323 = vmatprep.subr.mxu1 %v187_v21  ;;  %253 = vmatpush1.msra.mxu0 %v122_v22  ;;  %v180_v35 = vld [vmem:[#allocation4 + $0x270] sm:$0xff]  ;;  %v115_v36 = vld [vmem:[#allocation4 + $0x68] sm:$0xff]  ;;  %v114_v38 = vld [vmem:[#allocation4 + $0x60] sm:$0xff] }
  0x49   :  { %324 = vmatpush1.msra.mxu1 %v186_v23  ;;  %254 = vmatprep.subr.mxu0 %v121_v24  ;;  %v179_v37 = vld [vmem:[#allocation4 + $0x268] sm:$0xff]  ;;  %v178_v39 = vld [vmem:[#allocation4 + $0x260] sm:$0xff]  ;;  %v113_v40 = vld [vmem:[#allocation4 + $0x58] sm:$0xff] }
  0x4a   :  { %325 = vmatprep.subr.mxu1 %v185_v25  ;;  %255 = vmatpush1.msra.mxu0 %v120_v26  ;;  %v177_v41 = vld [vmem:[#allocation4 + $0x258] sm:$0xff]  ;;  %v112_v42 = vld [vmem:[#allocation4 + $0x50] sm:$0xff]  ;;  %v111_v44 = vld [vmem:[#allocation4 + $0x48] sm:$0xff] }
  0x4b   :  { %326 = vmatpush1.msra.mxu1 %v184_v27  ;;  %256 = vmatprep.subr.mxu0 %v119_v28  ;;  %v176_v43 = vld [vmem:[#allocation4 + $0x250] sm:$0xff]  ;;  %v175_v45 = vld [vmem:[#allocation4 + $0x248] sm:$0xff]  ;;  %v110_v46 = vld [vmem:[#allocation4 + $0x40] sm:$0xff] }
  0x4c   :  { %327 = vmatprep.subr.mxu1 %v183_v29  ;;  %257 = vmatpush1.msra.mxu0 %v118_v30  ;;  %v174_v47 = vld [vmem:[#allocation4 + $0x240] sm:$0xff]  ;;  %v109_v48 = vld [vmem:[#allocation4 + $0x38] sm:$0xff]  ;;  %v108_v50 = vld [vmem:[#allocation4 + $0x30] sm:$0xff] }
  0x4d   :  { %328 = vmatpush1.msra.mxu1 %v182_v31  ;;  %258 = vmatprep.subr.mxu0 %v117_v32  ;;  %v173_v49 = vld [vmem:[#allocation4 + $0x238] sm:$0xff]  ;;  %v172_v51 = vld [vmem:[#allocation4 + $0x230] sm:$0xff]  ;;  %v107_v52 = vld [vmem:[#allocation4 + $0x28] sm:$0xff] }
  0x4e   :  { %329 = vmatprep.subr.mxu1 %v181_v33  ;;  %259 = vmatpush1.msra.mxu0 %v116_v34  ;;  %v171_v53 = vld [vmem:[#allocation4 + $0x228] sm:$0xff]  ;;  %v106_v54 = vld [vmem:[#allocation4 + $0x20] sm:$0xff]  ;;  %v105_v56 = vld [vmem:[#allocation4 + $0x18] sm:$0xff] }
  0x4f   :  { %330 = vmatpush1.msra.mxu1 %v180_v35  ;;  %260 = vmatprep.subr.mxu0 %v115_v36  ;;  %v170_v55 = vld [vmem:[#allocation4 + $0x220] sm:$0xff]  ;;  %v169_v57 = vld [vmem:[#allocation4 + $0x218] sm:$0xff]  ;;  %v104_v58 = vld [vmem:[#allocation4 + $0x10] sm:$0xff] }
  0x50   :  { %331 = vmatprep.subr.mxu1 %v179_v37  ;;  %261 = vmatpush1.msra.mxu0 %v114_v38  ;;  %v168_v59 = vld [vmem:[#allocation4 + $0x210] sm:$0xff]  ;;  %v103_v60 = vld [vmem:[#allocation4 + $0x8] sm:$0xff]  ;;  %v102_v62 = vld [vmem:[#allocation4] sm:$0xff] }
  0x51   :  { %332 = vmatpush1.msra.mxu1 %v178_v39  ;;  %262 = vmatprep.subr.mxu0 %v113_v40  ;;  %v167_v61 = vld [vmem:[#allocation4 + $0x208] sm:$0xff]  ;;  %v166_v63 = vld [vmem:[#allocation4 + $0x200] sm:$0xff]  ;;  %v165_v0 = vld [vmem:[#allocation4 + $0x1f8] sm:$0xff] }
  0x52   :  { %333 = vmatprep.subr.mxu1 %v177_v41  ;;  %263 = vmatpush1.msra.mxu0 %v112_v42  ;;  %v229_v1 = vld [vmem:[#allocation4 + $0x3f8] sm:$0xff]  ;;  %v164_v2 = vld [vmem:[#allocation4 + $0x1f0] sm:$0xff]  ;;  %v163_v4 = vld [vmem:[#allocation4 + $0x1e8] sm:$0xff] }
  0x53   :  { %334 = vmatpush1.msra.mxu1 %v176_v43  ;;  %264 = vmatprep.subr.mxu0 %v111_v44  ;;  %v228_v3 = vld [vmem:[#allocation4 + $0x3f0] sm:$0xff]  ;;  %v227_v5 = vld [vmem:[#allocation4 + $0x3e8] sm:$0xff]  ;;  %v162_v6 = vld [vmem:[#allocation4 + $0x1e0] sm:$0xff] }
  0x54   :  { %335 = vmatprep.subr.mxu1 %v175_v45  ;;  %265 = vmatpush1.msra.mxu0 %v110_v46  ;;  %v226_v7 = vld [vmem:[#allocation4 + $0x3e0] sm:$0xff]  ;;  %v161_v8 = vld [vmem:[#allocation4 + $0x1d8] sm:$0xff]  ;;  %v160_v10 = vld [vmem:[#allocation4 + $0x1d0] sm:$0xff] }
  0x55   :  { %336 = vmatpush1.msra.mxu1 %v174_v47  ;;  %266 = vmatprep.subr.mxu0 %v109_v48  ;;  %v225_v9 = vld [vmem:[#allocation4 + $0x3d8] sm:$0xff]  ;;  %v224_v11 = vld [vmem:[#allocation4 + $0x3d0] sm:$0xff]  ;;  %v159_v12 = vld [vmem:[#allocation4 + $0x1c8] sm:$0xff] }
  0x56   :  { %337 = vmatprep.subr.mxu1 %v173_v49  ;;  %267 = vmatpush1.msra.mxu0 %v108_v50  ;;  %v223_v13 = vld [vmem:[#allocation4 + $0x3c8] sm:$0xff]  ;;  %v158_v14 = vld [vmem:[#allocation4 + $0x1c0] sm:$0xff]  ;;  %v157_v16 = vld [vmem:[#allocation4 + $0x1b8] sm:$0xff] }
  0x57   :  { %338 = vmatpush1.msra.mxu1 %v172_v51  ;;  %268 = vmatprep.subr.mxu0 %v107_v52  ;;  %v222_v15 = vld [vmem:[#allocation4 + $0x3c0] sm:$0xff]  ;;  %v221_v17 = vld [vmem:[#allocation4 + $0x3b8] sm:$0xff]  ;;  %v156_v18 = vld [vmem:[#allocation4 + $0x1b0] sm:$0xff] }
  0x58   :  { %339 = vmatprep.subr.mxu1 %v171_v53  ;;  %269 = vmatpush1.msra.mxu0 %v106_v54  ;;  %v220_v19 = vld [vmem:[#allocation4 + $0x3b0] sm:$0xff]  ;;  %v155_v20 = vld [vmem:[#allocation4 + $0x1a8] sm:$0xff]  ;;  %v154_v22 = vld [vmem:[#allocation4 + $0x1a0] sm:$0xff] }
  0x59   :  { %340 = vmatpush1.msra.mxu1 %v170_v55  ;;  %270 = vmatprep.subr.mxu0 %v105_v56  ;;  %v219_v21 = vld [vmem:[#allocation4 + $0x3a8] sm:$0xff]  ;;  %v218_v23 = vld [vmem:[#allocation4 + $0x3a0] sm:$0xff]  ;;  %v153_v24 = vld [vmem:[#allocation4 + $0x198] sm:$0xff] }
  0x5a   :  { %341 = vmatprep.subr.mxu1 %v169_v57  ;;  %271 = vmatpush1.msra.mxu0 %v104_v58  ;;  %v217_v25 = vld [vmem:[#allocation4 + $0x398] sm:$0xff]  ;;  %v152_v26 = vld [vmem:[#allocation4 + $0x190] sm:$0xff]  ;;  %v151_v28 = vld [vmem:[#allocation4 + $0x188] sm:$0xff] }
  0x5b   :  { %342 = vmatpush1.msra.mxu1 %v168_v59  ;;  %272 = vmatprep.subr.mxu0 %v103_v60  ;;  %v216_v27 = vld [vmem:[#allocation4 + $0x390] sm:$0xff]  ;;  %v215_v29 = vld [vmem:[#allocation4 + $0x388] sm:$0xff]  ;;  %v150_v30 = vld [vmem:[#allocation4 + $0x180] sm:$0xff] }
  0x5c   :  { %343 = vmatprep.subr.mxu1 %v167_v61  ;;  %273 = vmatpush1.msra.mxu0 %v102_v62  ;;  %v214_v31 = vld [vmem:[#allocation4 + $0x380] sm:$0xff]  ;;  %v149_v32 = vld [vmem:[#allocation4 + $0x178] sm:$0xff]  ;;  %v148_v34 = vld [vmem:[#allocation4 + $0x170] sm:$0xff] }
  0x5d   :  { %344 = vmatpush1.msra.mxu1 %v166_v63  ;;  %274 = vmatprep.subr.mxu0 %v165_v0  ;;  %v213_v33 = vld [vmem:[#allocation4 + $0x378] sm:$0xff]  ;;  %v212_v35 = vld [vmem:[#allocation4 + $0x370] sm:$0xff]  ;;  %v147_v36 = vld [vmem:[#allocation4 + $0x168] sm:$0xff] }
  0x5e   :  { %345 = vmatprep.subr.mxu1 %v229_v1  ;;  %275 = vmatpush2.msra.mxu0 %v164_v2  ;;  %v211_v37 = vld [vmem:[#allocation4 + $0x368] sm:$0xff]  ;;  %v146_v38 = vld [vmem:[#allocation4 + $0x160] sm:$0xff]  ;;  %v145_v40 = vld [vmem:[#allocation4 + $0x158] sm:$0xff] }
  0x5f   :  { %346 = vmatpush2.msra.mxu1 %v228_v3  ;;  %276 = vmatprep.subr.mxu0 %v163_v4  ;;  %v210_v39 = vld [vmem:[#allocation4 + $0x360] sm:$0xff]  ;;  %v209_v41 = vld [vmem:[#allocation4 + $0x358] sm:$0xff]  ;;  %v144_v42 = vld [vmem:[#allocation4 + $0x150] sm:$0xff] }
  0x60   :  { %347 = vmatprep.subr.mxu1 %v227_v5  ;;  %277 = vmatpush2.msra.mxu0 %v162_v6  ;;  %v208_v43 = vld [vmem:[#allocation4 + $0x350] sm:$0xff]  ;;  %v143_v44 = vld [vmem:[#allocation4 + $0x148] sm:$0xff]  ;;  %v142_v46 = vld [vmem:[#allocation4 + $0x140] sm:$0xff] }
  0x61   :  { %348 = vmatpush2.msra.mxu1 %v226_v7  ;;  %278 = vmatprep.subr.mxu0 %v161_v8  ;;  %v207_v45 = vld [vmem:[#allocation4 + $0x348] sm:$0xff]  ;;  %v206_v47 = vld [vmem:[#allocation4 + $0x340] sm:$0xff]  ;;  %v141_v48 = vld [vmem:[#allocation4 + $0x138] sm:$0xff] }
  0x62   :  { %349 = vmatprep.subr.mxu1 %v225_v9  ;;  %279 = vmatpush2.msra.mxu0 %v160_v10  ;;  %v205_v49 = vld [vmem:[#allocation4 + $0x338] sm:$0xff]  ;;  %v140_v50 = vld [vmem:[#allocation4 + $0x130] sm:$0xff]  ;;  %v139_v52 = vld [vmem:[#allocation4 + $0x128] sm:$0xff] }
  0x63   :  { %350 = vmatpush2.msra.mxu1 %v224_v11  ;;  %280 = vmatprep.subr.mxu0 %v159_v12  ;;  %v204_v51 = vld [vmem:[#allocation4 + $0x330] sm:$0xff]  ;;  %v203_v53 = vld [vmem:[#allocation4 + $0x328] sm:$0xff]  ;;  %v138_v54 = vld [vmem:[#allocation4 + $0x120] sm:$0xff] }
  0x64   :  { %351 = vmatprep.subr.mxu1 %v223_v13  ;;  %281 = vmatpush2.msra.mxu0 %v158_v14  ;;  %v202_v55 = vld [vmem:[#allocation4 + $0x320] sm:$0xff]  ;;  %v137_v56 = vld [vmem:[#allocation4 + $0x118] sm:$0xff]  ;;  %v136_v58 = vld [vmem:[#allocation4 + $0x110] sm:$0xff] }
  0x65   :  { %352 = vmatpush2.msra.mxu1 %v222_v15  ;;  %282 = vmatprep.subr.mxu0 %v157_v16  ;;  %v201_v57 = vld [vmem:[#allocation4 + $0x318] sm:$0xff]  ;;  %v200_v59 = vld [vmem:[#allocation4 + $0x310] sm:$0xff]  ;;  %v135_v60 = vld [vmem:[#allocation4 + $0x108] sm:$0xff] }
  0x66   :  { %353 = vmatprep.subr.mxu1 %v221_v17  ;;  %283 = vmatpush2.msra.mxu0 %v156_v18  ;;  %v199_v61 = vld [vmem:[#allocation4 + $0x308] sm:$0xff]  ;;  %v134_v62 = vld [vmem:[#allocation4 + $0x100] sm:$0xff]  ;;  %v101_v1 = vld [vmem:[#allocation2 + $0x18] sm:$0xff] }
  0x67   :  { %354 = vmatpush2.msra.mxu1 %v220_v19  ;;  %284 = vmatprep.subr.mxu0 %v155_v20  ;;  %v99_v63 = vld [vmem:[#allocation2 + $0x8] sm:$0xff]  ;;  %v198_v0 = vld [vmem:[#allocation4 + $0x300] sm:$0xff]  ;;  %v100_v3 = vld [vmem:[#allocation2 + $0x10] sm:$0xff] }
  0x68   :  { %355 = vmatprep.subr.mxu1 %v219_v21  ;;  %285 = vmatpush2.msra.mxu0 %v154_v22  ;;  %v98_v2 = vld [vmem:[#allocation2] sm:$0xff]  ;;  %v417_v4 = vld [vmem:[#allocation6 + $0xf8] sm:$0xff]  ;;  %v416_v5 = vld [vmem:[#allocation6 + $0xf0] sm:$0xff] }
  0x69   :  { %356 = vmatpush2.msra.mxu1 %v218_v23  ;;  %286 = vmatprep.subr.mxu0 %v153_v24  ;;  %v415_v6 = vld [vmem:[#allocation6 + $0xe8] sm:$0xff]  ;;  %v414_v7 = vld [vmem:[#allocation6 + $0xe0] sm:$0xff]  ;;  %v413_v8 = vld [vmem:[#allocation6 + $0xd8] sm:$0xff] }
  0x6a   :  { %357 = vmatprep.subr.mxu1 %v217_v25  ;;  %287 = vmatpush2.msra.mxu0 %v152_v26  ;;  %v412_v9 = vld [vmem:[#allocation6 + $0xd0] sm:$0xff]  ;;  %v411_v10 = vld [vmem:[#allocation6 + $0xc8] sm:$0xff]  ;;  %v410_v11 = vld [vmem:[#allocation6 + $0xc0] sm:$0xff] }
  0x6b   :  { %358 = vmatpush2.msra.mxu1 %v216_v27  ;;  %288 = vmatprep.subr.mxu0 %v151_v28  ;;  %v409_v12 = vld [vmem:[#allocation6 + $0xb8] sm:$0xff]  ;;  %v408_v13 = vld [vmem:[#allocation6 + $0xb0] sm:$0xff]  ;;  %v407_v14 = vld [vmem:[#allocation6 + $0xa8] sm:$0xff] }
  0x6c   :  { %359 = vmatprep.subr.mxu1 %v215_v29  ;;  %289 = vmatpush2.msra.mxu0 %v150_v30  ;;  %v406_v15 = vld [vmem:[#allocation6 + $0xa0] sm:$0xff]  ;;  %v405_v16 = vld [vmem:[#allocation6 + $0x98] sm:$0xff]  ;;  %v404_v17 = vld [vmem:[#allocation6 + $0x90] sm:$0xff] }
  0x6d   :  { %360 = vmatpush2.msra.mxu1 %v214_v31  ;;  %290 = vmatprep.subr.mxu0 %v149_v32  ;;  %v403_v18 = vld [vmem:[#allocation6 + $0x88] sm:$0xff]  ;;  %v402_v19 = vld [vmem:[#allocation6 + $0x80] sm:$0xff]  ;;  %v401_v20 = vld [vmem:[#allocation6 + $0x78] sm:$0xff] }
  0x6e   :  { %361 = vmatprep.subr.mxu1 %v213_v33  ;;  %291 = vmatpush2.msra.mxu0 %v148_v34  ;;  %v400_v21 = vld [vmem:[#allocation6 + $0x70] sm:$0xff]  ;;  %v399_v22 = vld [vmem:[#allocation6 + $0x68] sm:$0xff]  ;;  %v398_v23 = vld [vmem:[#allocation6 + $0x60] sm:$0xff] }
  0x6f   :  { %362 = vmatpush2.msra.mxu1 %v212_v35  ;;  %292 = vmatprep.subr.mxu0 %v147_v36  ;;  %v397_v24 = vld [vmem:[#allocation6 + $0x58] sm:$0xff]  ;;  %v396_v25 = vld [vmem:[#allocation6 + $0x50] sm:$0xff]  ;;  %v395_v26 = vld [vmem:[#allocation6 + $0x48] sm:$0xff] }
  0x70   :  { %363 = vmatprep.subr.mxu1 %v211_v37  ;;  %293 = vmatpush2.msra.mxu0 %v146_v38  ;;  %v394_v27 = vld [vmem:[#allocation6 + $0x40] sm:$0xff]  ;;  %v393_v28 = vld [vmem:[#allocation6 + $0x38] sm:$0xff]  ;;  %v392_v29 = vld [vmem:[#allocation6 + $0x30] sm:$0xff] }
  0x71   :  { %364 = vmatpush2.msra.mxu1 %v210_v39  ;;  %294 = vmatprep.subr.mxu0 %v145_v40  ;;  %v391_v30 = vld [vmem:[#allocation6 + $0x28] sm:$0xff]  ;;  %v390_v31 = vld [vmem:[#allocation6 + $0x20] sm:$0xff]  ;;  %v389_v32 = vld [vmem:[#allocation6 + $0x18] sm:$0xff] }
  0x72   :  { %365 = vmatprep.subr.mxu1 %v209_v41  ;;  %295 = vmatpush2.msra.mxu0 %v144_v42  ;;  %v388_v33 = vld [vmem:[#allocation6 + $0x10] sm:$0xff]  ;;  %v387_v34 = vld [vmem:[#allocation6 + $0x8] sm:$0xff]  ;;  %v386_v35 = vld [vmem:[#allocation6] sm:$0xff] }
  0x73   :  { %366 = vmatpush2.msra.mxu1 %v208_v43  ;;  %296 = vmatprep.subr.mxu0 %v143_v44  ;;  %v449_v36 = vld [vmem:[#allocation6 + $0x1f8] sm:$0xff]  ;;  %v448_v37 = vld [vmem:[#allocation6 + $0x1f0] sm:$0xff]  ;;  %v447_v38 = vld [vmem:[#allocation6 + $0x1e8] sm:$0xff] }
  0x74   :  { %367 = vmatprep.subr.mxu1 %v207_v45  ;;  %297 = vmatpush2.msra.mxu0 %v142_v46  ;;  %v446_v39 = vld [vmem:[#allocation6 + $0x1e0] sm:$0xff]  ;;  %v445_v40 = vld [vmem:[#allocation6 + $0x1d8] sm:$0xff]  ;;  %v444_v41 = vld [vmem:[#allocation6 + $0x1d0] sm:$0xff] }
  0x75   :  { %368 = vmatpush2.msra.mxu1 %v206_v47  ;;  %298 = vmatprep.subr.mxu0 %v141_v48  ;;  %v443_v42 = vld [vmem:[#allocation6 + $0x1c8] sm:$0xff]  ;;  %v442_v43 = vld [vmem:[#allocation6 + $0x1c0] sm:$0xff]  ;;  %v441_v44 = vld [vmem:[#allocation6 + $0x1b8] sm:$0xff] }
  0x76   :  { %369 = vmatprep.subr.mxu1 %v205_v49  ;;  %299 = vmatpush2.msra.mxu0 %v140_v50  ;;  %v440_v45 = vld [vmem:[#allocation6 + $0x1b0] sm:$0xff]  ;;  %v439_v46 = vld [vmem:[#allocation6 + $0x1a8] sm:$0xff]  ;;  %v438_v47 = vld [vmem:[#allocation6 + $0x1a0] sm:$0xff] }
  0x77   :  { %370 = vmatpush2.msra.mxu1 %v204_v51  ;;  %300 = vmatprep.subr.mxu0 %v139_v52  ;;  %v437_v48 = vld [vmem:[#allocation6 + $0x198] sm:$0xff]  ;;  %v436_v49 = vld [vmem:[#allocation6 + $0x190] sm:$0xff]  ;;  %v435_v50 = vld [vmem:[#allocation6 + $0x188] sm:$0xff] }
  0x78   :  { %371 = vmatprep.subr.mxu1 %v203_v53  ;;  %301 = vmatpush2.msra.mxu0 %v138_v54  ;;  %v434_v51 = vld [vmem:[#allocation6 + $0x180] sm:$0xff]  ;;  %v433_v52 = vld [vmem:[#allocation6 + $0x178] sm:$0xff]  ;;  %v432_v53 = vld [vmem:[#allocation6 + $0x170] sm:$0xff] }
  0x79   :  { %372 = vmatpush2.msra.mxu1 %v202_v55  ;;  %302 = vmatprep.subr.mxu0 %v137_v56  ;;  %v431_v54 = vld [vmem:[#allocation6 + $0x168] sm:$0xff]  ;;  %v430_v55 = vld [vmem:[#allocation6 + $0x160] sm:$0xff]  ;;  %v429_v56 = vld [vmem:[#allocation6 + $0x158] sm:$0xff] }
  0x7a   :  { %373 = vmatprep.subr.mxu1 %v201_v57  ;;  %303 = vmatpush2.msra.mxu0 %v136_v58  ;;  %v428_v57 = vld [vmem:[#allocation6 + $0x150] sm:$0xff]  ;;  %v427_v58 = vld [vmem:[#allocation6 + $0x148] sm:$0xff] }
  0x7b   :  { %374 = vmatpush2.msra.mxu1 %v200_v59  ;;  %304 = vmatprep.subr.mxu0 %v135_v60  ;;  %v426_v59 = vld [vmem:[#allocation6 + $0x140] sm:$0xff]  ;;  %v425_v60 = vld [vmem:[#allocation6 + $0x138] sm:$0xff] }
  0x7c   :  { %375 = vmatprep.subr.mxu1 %v199_v61  ;;  %305 = vmatpush2.msra.mxu0 %v134_v62  ;;  %v424_v61 = vld [vmem:[#allocation6 + $0x130] sm:$0xff]  ;;  %v423_v62 = vld [vmem:[#allocation6 + $0x128] sm:$0xff] }
  0x7d   :  { %306 = vmatprep.mubr.f32.mxu0 %v99_v63  ;;  %376 = vmatpush2.msra.mxu1 %v198_v0  ;;  %v422_v63 = vld [vmem:[#allocation6 + $0x120] sm:$0xff]  ;;  %v421_v0 = vld [vmem:[#allocation6 + $0x118] sm:$0xff] }
  0x7e   :  { %377 = vmatprep.mubr.f32.mxu1 %v101_v1  ;;  %307 = vmatmul.mubr.f32.vlgmr.msra.gmra.mxu0 %v98_v2  ;;  %v420_v1 = vld [vmem:[#allocation6 + $0x110] sm:$0xff]  ;;  %v419_v2 = vld [vmem:[#allocation6 + $0x108] sm:$0xff] }
  0x7f   :  { %378 = vmatmul.mubr.f32.vlgmr.msra.gmra.mxu1 %v100_v3  ;;  %462 = vmatprep.subr.mxu0 %v417_v4  ;;  %v418_v3 = vld [vmem:[#allocation6 + $0x100] sm:$0xff]  ;;  %v566_v4 = vld [vmem:[#allocation7 + $0xf8] sm:$0xff] }
  0x80   :  { %463 = vmatpush1.msra.mxu0 %v416_v5  ;;  %v565_v5 = vld [vmem:[#allocation7 + $0xf0] sm:$0xff]  ;;  %611 = vmatprep.subr.mxu1 %v566_v4 }
  0x81   :  { %464 = vmatprep.subr.mxu0 %v415_v6  ;;  %v564_v6 = vld [vmem:[#allocation7 + $0xe8] sm:$0xff]  ;;  %612 = vmatpush1.msra.mxu1 %v565_v5 }
  0x82   :  { %465 = vmatpush1.msra.mxu0 %v414_v7  ;;  %v563_v7 = vld [vmem:[#allocation7 + $0xe0] sm:$0xff]  ;;  %613 = vmatprep.subr.mxu1 %v564_v6 }
  0x83   :  { %466 = vmatprep.subr.mxu0 %v413_v8  ;;  %v562_v8 = vld [vmem:[#allocation7 + $0xd8] sm:$0xff]  ;;  %614 = vmatpush1.msra.mxu1 %v563_v7 }
  0x84   :  { %467 = vmatpush1.msra.mxu0 %v412_v9  ;;  %v561_v9 = vld [vmem:[#allocation7 + $0xd0] sm:$0xff]  ;;  %615 = vmatprep.subr.mxu1 %v562_v8 }
  0x85   :  { %468 = vmatprep.subr.mxu0 %v411_v10  ;;  %v560_v10 = vld [vmem:[#allocation7 + $0xc8] sm:$0xff]  ;;  %616 = vmatpush1.msra.mxu1 %v561_v9 }
  0x86   :  { %469 = vmatpush1.msra.mxu0 %v410_v11  ;;  %v559_v11 = vld [vmem:[#allocation7 + $0xc0] sm:$0xff]  ;;  %617 = vmatprep.subr.mxu1 %v560_v10 }
  0x87   :  { %470 = vmatprep.subr.mxu0 %v409_v12  ;;  %v558_v12 = vld [vmem:[#allocation7 + $0xb8] sm:$0xff]  ;;  %618 = vmatpush1.msra.mxu1 %v559_v11 }
  0x88   :  { %471 = vmatpush1.msra.mxu0 %v408_v13  ;;  %v557_v13 = vld [vmem:[#allocation7 + $0xb0] sm:$0xff]  ;;  %619 = vmatprep.subr.mxu1 %v558_v12 }
  0x89   :  { %472 = vmatprep.subr.mxu0 %v407_v14  ;;  %v556_v14 = vld [vmem:[#allocation7 + $0xa8] sm:$0xff]  ;;  %620 = vmatpush1.msra.mxu1 %v557_v13  ;;  %v574_v13 = vld [vmem:[#allocation7 + $0x138] sm:$0xff] }
  0x8a   :  { %473 = vmatpush1.msra.mxu0 %v406_v15  ;;  %v555_v15 = vld [vmem:[#allocation7 + $0xa0] sm:$0xff]  ;;  %621 = vmatprep.subr.mxu1 %v556_v14  ;;  %v573_v14 = vld [vmem:[#allocation7 + $0x130] sm:$0xff] }
  0x8b   :  { %474 = vmatprep.subr.mxu0 %v405_v16  ;;  %v554_v16 = vld [vmem:[#allocation7 + $0x98] sm:$0xff]  ;;  %622 = vmatpush1.msra.mxu1 %v555_v15  ;;  %v572_v15 = vld [vmem:[#allocation7 + $0x128] sm:$0xff] }
  0x8c   :  { %475 = vmatpush1.msra.mxu0 %v404_v17  ;;  %v553_v17 = vld [vmem:[#allocation7 + $0x90] sm:$0xff]  ;;  %623 = vmatprep.subr.mxu1 %v554_v16  ;;  %v571_v16 = vld [vmem:[#allocation7 + $0x120] sm:$0xff] }
  0x8d   :  { %476 = vmatprep.subr.mxu0 %v403_v18  ;;  %v552_v18 = vld [vmem:[#allocation7 + $0x88] sm:$0xff]  ;;  %624 = vmatpush1.msra.mxu1 %v553_v17  ;;  %v570_v17 = vld [vmem:[#allocation7 + $0x118] sm:$0xff] }
  0x8e   :  { %477 = vmatpush1.msra.mxu0 %v402_v19  ;;  %v551_v19 = vld [vmem:[#allocation7 + $0x80] sm:$0xff]  ;;  %625 = vmatprep.subr.mxu1 %v552_v18  ;;  %v569_v18 = vld [vmem:[#allocation7 + $0x110] sm:$0xff] }
  0x8f   :  { %478 = vmatprep.subr.mxu0 %v401_v20  ;;  %v550_v20 = vld [vmem:[#allocation7 + $0x78] sm:$0xff]  ;;  %626 = vmatpush1.msra.mxu1 %v551_v19  ;;  %v568_v19 = vld [vmem:[#allocation7 + $0x108] sm:$0xff] }
  0x90   :  { %479 = vmatpush1.msra.mxu0 %v400_v21  ;;  %v549_v21 = vld [vmem:[#allocation7 + $0x70] sm:$0xff]  ;;  %627 = vmatprep.subr.mxu1 %v550_v20  ;;  %v567_v20 = vld [vmem:[#allocation7 + $0x100] sm:$0xff] }
  0x91   :  { %480 = vmatprep.subr.mxu0 %v399_v22  ;;  %v548_v22 = vld [vmem:[#allocation7 + $0x68] sm:$0xff]  ;;  %628 = vmatpush1.msra.mxu1 %v549_v21  ;;  %v715_v21 = vld [vmem:[#allocation9 + $0xf8] sm:$0xff] }
  0x92   :  { %481 = vmatpush1.msra.mxu0 %v398_v23  ;;  %v547_v23 = vld [vmem:[#allocation7 + $0x60] sm:$0xff]  ;;  %629 = vmatprep.subr.mxu1 %v548_v22  ;;  %v699_v22 = vld [vmem:[#allocation9 + $0x78] sm:$0xff] }
  0x93   :  { %482 = vmatprep.subr.mxu0 %v397_v24  ;;  %v546_v24 = vld [vmem:[#allocation7 + $0x58] sm:$0xff]  ;;  %630 = vmatpush1.msra.mxu1 %v547_v23  ;;  %v714_v23 = vld [vmem:[#allocation9 + $0xf0] sm:$0xff] }
  0x94   :  { %483 = vmatpush1.msra.mxu0 %v396_v25  ;;  %v545_v25 = vld [vmem:[#allocation7 + $0x50] sm:$0xff]  ;;  %631 = vmatprep.subr.mxu1 %v546_v24 }
  0x95   :  { %484 = vmatprep.subr.mxu0 %v395_v26  ;;  %v544_v26 = vld [vmem:[#allocation7 + $0x48] sm:$0xff]  ;;  %632 = vmatpush1.msra.mxu1 %v545_v25  ;;  %v698_v24 = vld [vmem:[#allocation9 + $0x70] sm:$0xff] }
  0x96   :  { %485 = vmatpush1.msra.mxu0 %v394_v27  ;;  %v543_v27 = vld [vmem:[#allocation7 + $0x40] sm:$0xff]  ;;  %633 = vmatprep.subr.mxu1 %v544_v26  ;;  %v713_v25 = vld [vmem:[#allocation9 + $0xe8] sm:$0xff] }
  0x97   :  { %486 = vmatprep.subr.mxu0 %v393_v28  ;;  %v542_v28 = vld [vmem:[#allocation7 + $0x38] sm:$0xff]  ;;  %634 = vmatpush1.msra.mxu1 %v543_v27  ;;  %v697_v26 = vld [vmem:[#allocation9 + $0x68] sm:$0xff]  ;;  %v712_v27 = vld [vmem:[#allocation9 + $0xe0] sm:$0xff] }
  0x98   :  { %487 = vmatpush1.msra.mxu0 %v392_v29  ;;  %v541_v29 = vld [vmem:[#allocation7 + $0x30] sm:$0xff]  ;;  %635 = vmatprep.subr.mxu1 %v542_v28  ;;  %v696_v28 = vld [vmem:[#allocation9 + $0x60] sm:$0xff] }
  0x99   :  { %488 = vmatprep.subr.mxu0 %v391_v30  ;;  %v540_v30 = vld [vmem:[#allocation7 + $0x28] sm:$0xff]  ;;  %636 = vmatpush1.msra.mxu1 %v541_v29  ;;  %v711_v29 = vld [vmem:[#allocation9 + $0xd8] sm:$0xff] }
  0x9a   :  { %489 = vmatpush1.msra.mxu0 %v390_v31  ;;  %v539_v31 = vld [vmem:[#allocation7 + $0x20] sm:$0xff]  ;;  %637 = vmatprep.subr.mxu1 %v540_v30  ;;  %v695_v30 = vld [vmem:[#allocation9 + $0x58] sm:$0xff] }
  0x9b   :  { %490 = vmatprep.subr.mxu0 %v389_v32  ;;  %v538_v32 = vld [vmem:[#allocation7 + $0x18] sm:$0xff]  ;;  %638 = vmatpush1.msra.mxu1 %v539_v31  ;;  %v710_v31 = vld [vmem:[#allocation9 + $0xd0] sm:$0xff] }
  0x9c   :  { %491 = vmatpush1.msra.mxu0 %v388_v33  ;;  %v537_v33 = vld [vmem:[#allocation7 + $0x10] sm:$0xff]  ;;  %639 = vmatprep.subr.mxu1 %v538_v32 }
  0x9d   :  { %492 = vmatprep.subr.mxu0 %v387_v34  ;;  %v536_v34 = vld [vmem:[#allocation7 + $0x8] sm:$0xff]  ;;  %640 = vmatpush1.msra.mxu1 %v537_v33  ;;  %v694_v32 = vld [vmem:[#allocation9 + $0x50] sm:$0xff] }
  0x9e   :  { %493 = vmatpush1.msra.mxu0 %v386_v35  ;;  %v535_v35 = vld [vmem:[#allocation7] sm:$0xff]  ;;  %641 = vmatprep.subr.mxu1 %v536_v34  ;;  %v709_v33 = vld [vmem:[#allocation9 + $0xc8] sm:$0xff] }
  0x9f   :  { %494 = vmatprep.subr.mxu0 %v449_v36  ;;  %v598_v36 = vld [vmem:[#allocation7 + $0x1f8] sm:$0xff]  ;;  %642 = vmatpush1.msra.mxu1 %v535_v35  ;;  %v693_v34 = vld [vmem:[#allocation9 + $0x48] sm:$0xff]  ;;  %v708_v35 = vld [vmem:[#allocation9 + $0xc0] sm:$0xff] }
  0xa0   :  { %495 = vmatpush2.msra.mxu0 %v448_v37  ;;  %v597_v37 = vld [vmem:[#allocation7 + $0x1f0] sm:$0xff]  ;;  %643 = vmatprep.subr.mxu1 %v598_v36  ;;  %v692_v36 = vld [vmem:[#allocation9 + $0x40] sm:$0xff] }
  0xa1   :  { %496 = vmatprep.subr.mxu0 %v447_v38  ;;  %v596_v38 = vld [vmem:[#allocation7 + $0x1e8] sm:$0xff]  ;;  %644 = vmatpush2.msra.mxu1 %v597_v37  ;;  %v707_v37 = vld [vmem:[#allocation9 + $0xb8] sm:$0xff] }
  0xa2   :  { %497 = vmatpush2.msra.mxu0 %v446_v39  ;;  %v595_v39 = vld [vmem:[#allocation7 + $0x1e0] sm:$0xff]  ;;  %645 = vmatprep.subr.mxu1 %v596_v38  ;;  %v691_v38 = vld [vmem:[#allocation9 + $0x38] sm:$0xff] }
  0xa3   :  { %498 = vmatprep.subr.mxu0 %v445_v40  ;;  %v594_v40 = vld [vmem:[#allocation7 + $0x1d8] sm:$0xff]  ;;  %646 = vmatpush2.msra.mxu1 %v595_v39  ;;  %v706_v39 = vld [vmem:[#allocation9 + $0xb0] sm:$0xff] }
  0xa4   :  { %499 = vmatpush2.msra.mxu0 %v444_v41  ;;  %v593_v41 = vld [vmem:[#allocation7 + $0x1d0] sm:$0xff]  ;;  %647 = vmatprep.subr.mxu1 %v594_v40 }
  0xa5   :  { %500 = vmatprep.subr.mxu0 %v443_v42  ;;  %v592_v42 = vld [vmem:[#allocation7 + $0x1c8] sm:$0xff]  ;;  %648 = vmatpush2.msra.mxu1 %v593_v41  ;;  %v690_v40 = vld [vmem:[#allocation9 + $0x30] sm:$0xff] }
  0xa6   :  { %501 = vmatpush2.msra.mxu0 %v442_v43  ;;  %v591_v43 = vld [vmem:[#allocation7 + $0x1c0] sm:$0xff]  ;;  %649 = vmatprep.subr.mxu1 %v592_v42  ;;  %v705_v41 = vld [vmem:[#allocation9 + $0xa8] sm:$0xff] }
  0xa7   :  { %502 = vmatprep.subr.mxu0 %v441_v44  ;;  %v590_v44 = vld [vmem:[#allocation7 + $0x1b8] sm:$0xff]  ;;  %650 = vmatpush2.msra.mxu1 %v591_v43  ;;  %v689_v42 = vld [vmem:[#allocation9 + $0x28] sm:$0xff]  ;;  %v704_v43 = vld [vmem:[#allocation9 + $0xa0] sm:$0xff] }
  0xa8   :  { %503 = vmatpush2.msra.mxu0 %v440_v45  ;;  %v589_v45 = vld [vmem:[#allocation7 + $0x1b0] sm:$0xff]  ;;  %651 = vmatprep.subr.mxu1 %v590_v44  ;;  %v688_v44 = vld [vmem:[#allocation9 + $0x20] sm:$0xff] }
  0xa9   :  { %504 = vmatprep.subr.mxu0 %v439_v46  ;;  %v588_v46 = vld [vmem:[#allocation7 + $0x1a8] sm:$0xff]  ;;  %652 = vmatpush2.msra.mxu1 %v589_v45  ;;  %v450_v45 = vld [vmem:[%s1076_s4] sm:$0x3] }
  0xaa   :  { %505 = vmatpush2.msra.mxu0 %v438_v47  ;;  %v587_v47 = vld [vmem:[#allocation7 + $0x1a0] sm:$0xff]  ;;  %653 = vmatprep.subr.mxu1 %v588_v46 }
  0xab   :  { %506 = vmatprep.subr.mxu0 %v437_v48  ;;  %v586_v48 = vld [vmem:[#allocation7 + $0x198] sm:$0xff]  ;;  %654 = vmatpush2.msra.mxu1 %v587_v47 }
  0xac   :  { %507 = vmatpush2.msra.mxu0 %v436_v49  ;;  %v585_v49 = vld [vmem:[#allocation7 + $0x190] sm:$0xff]  ;;  %655 = vmatprep.subr.mxu1 %v586_v48 }
  0xad   :  { %508 = vmatprep.subr.mxu0 %v435_v50  ;;  %v584_v50 = vld [vmem:[#allocation7 + $0x188] sm:$0xff]  ;;  %656 = vmatpush2.msra.mxu1 %v585_v49 }
  0xae   :  { %509 = vmatpush2.msra.mxu0 %v434_v51  ;;  %v583_v51 = vld [vmem:[#allocation7 + $0x180] sm:$0xff]  ;;  %657 = vmatprep.subr.mxu1 %v584_v50 }
  0xaf   :  { %510 = vmatprep.subr.mxu0 %v433_v52  ;;  %v582_v52 = vld [vmem:[#allocation7 + $0x178] sm:$0xff]  ;;  %658 = vmatpush2.msra.mxu1 %v583_v51 }
  0xb0   :  { %511 = vmatpush2.msra.mxu0 %v432_v53  ;;  %v581_v53 = vld [vmem:[#allocation7 + $0x170] sm:$0xff]  ;;  %659 = vmatprep.subr.mxu1 %v582_v52 }
  0xb1   :  { %512 = vmatprep.subr.mxu0 %v431_v54  ;;  %v580_v54 = vld [vmem:[#allocation7 + $0x168] sm:$0xff]  ;;  %660 = vmatpush2.msra.mxu1 %v581_v53 }
  0xb2   :  { %513 = vmatpush2.msra.mxu0 %v430_v55  ;;  %v579_v55 = vld [vmem:[#allocation7 + $0x160] sm:$0xff]  ;;  %661 = vmatprep.subr.mxu1 %v580_v54  ;;  %v703_v54 = vld [vmem:[#allocation9 + $0x98] sm:$0xff] }
  0xb3   :  { %514 = vmatprep.subr.mxu0 %v429_v56  ;;  %v578_v56 = vld [vmem:[#allocation7 + $0x158] sm:$0xff]  ;;  %662 = vmatpush2.msra.mxu1 %v579_v55 }
  0xb4   :  { %515 = vmatpush2.msra.mxu0 %v428_v57  ;;  %v577_v57 = vld [vmem:[#allocation7 + $0x150] sm:$0xff]  ;;  %663 = vmatprep.subr.mxu1 %v578_v56  ;;  %v687_v55 = vld [vmem:[#allocation9 + $0x18] sm:$0xff] }
  0xb5   :  { %516 = vmatprep.subr.mxu0 %v427_v58  ;;  %v576_v58 = vld [vmem:[#allocation7 + $0x148] sm:$0xff]  ;;  %664 = vmatpush2.msra.mxu1 %v577_v57  ;;  %v702_v56 = vld [vmem:[#allocation9 + $0x90] sm:$0xff] }
  0xb6   :  { %517 = vmatpush2.msra.mxu0 %v426_v59  ;;  %v575_v59 = vld [vmem:[#allocation7 + $0x140] sm:$0xff]  ;;  %665 = vmatprep.subr.mxu1 %v576_v58  ;;  %v686_v57 = vld [vmem:[#allocation9 + $0x10] sm:$0xff]  ;;  %v701_v58 = vld [vmem:[#allocation9 + $0x88] sm:$0xff] }
  0xb7   :  { %518 = vmatprep.subr.mxu0 %v425_v60  ;;  %666 = vmatpush2.msra.mxu1 %v575_v59  ;;  %v232_v60 = vlaneseq  ;;  %v685_v59 = vld [vmem:[#allocation9 + $0x8] sm:$0xff] }
  0xb8   :  { %519 = vmatpush2.msra.mxu0 %v424_v61  ;;  %667 = vmatprep.subr.mxu1 %v574_v13 }
  0xb9   :  { %520 = vmatprep.subr.mxu0 %v423_v62  ;;  %v233_v61 = vshrl.u32 %v232_v60, 7  ;;  %668 = vmatpush2.msra.mxu1 %v573_v14  ;;  %v700_v60 = vld [vmem:[#allocation9 + $0x80] sm:$0xff] }
  0xba   :  { %521 = vmatpush2.msra.mxu0 %v422_v63  ;;  %v230_v63 = vld [vmem:[%s1074_s2] sm:$0x3]  ;;  %669 = vmatprep.subr.mxu1 %v572_v15 }
  0xbb   :  { %522 = vmatprep.subr.mxu0 %v421_v0  ;;  %v1047_v62 = vsub.s32 0, %v233_v61  ;;  %v1052_v0 = vsub.s32 1, %v233_v61  ;;  %670 = vmatpush2.msra.mxu1 %v571_v16  ;;  %v684_v61 = vld [vmem:[#allocation9] sm:$0xff] }
  0xbc   :  { %523 = vmatpush2.msra.mxu0 %v420_v1  ;;  %671 = vmatprep.subr.mxu1 %v570_v17 }
  0xbd   :  { %524 = vmatprep.subr.mxu0 %v419_v2  ;;  %v235_v1 = vrot.slane %v230_v63, %v1047_v62  ;;  %v239_v2 = vrot.slane %v230_v63, %v1052_v0  ;;  %672 = vmatpush2.msra.mxu1 %v569_v18  ;;  %v455_v46 = vrot.slane %v450_v45, %v1047_v62  ;;  %v599_v63 = vld [vmem:[%s1078_s6] sm:$0x3] }
  0xbe   :  { %525 = vmatpush2.msra.mxu0 %v418_v3  ;;  %673 = vmatprep.subr.mxu1 %v568_v19  ;;  %v459_v47 = vrot.slane %v450_v45, %v1052_v0 }
  0xbf   :  { %674 = vmatpush2.msra.mxu1 %v567_v20  ;;  %810 = vmatprep.subr.mxu0 %v715_v21 }
 0x13e   :  { %v308_v3 = vpop.f32.mrf.mxu0 }
 0x13f   :  { %v379_v4 = vpop.f32.mrf.mxu1  ;;  %v309_v5 = vadd.f32 %v308_v3, %v235_v1  ;;  %v604_v1 = vrot.slane %v599_v63, %v1047_v62 }
 0x140   :  { %v310_v6 = vpop.f32.mrf.mxu0 }
 0x141   :  { %v311_v7 = vadd.f32 %v310_v6, %v239_v2  ;;  %v380_v8 = vadd.f32 %v379_v4, %v309_v5  ;;  %v381_v9 = vpop.f32.mrf.mxu1  ;;  %v608_v2 = vrot.slane %v599_v63, %v1052_v0 }
 0x143   :  { %v382_v10 = vadd.f32 %v381_v9, %v311_v7  ;;  %v384_v12 = vmax.f32 %v380_v8, 0.0 }
 0x145   :  { %v385_v11 = vmax.f32 %v382_v10, 0.0  ;;  %v808_v10 = vld [vmem:[%s1080_s8] ss:$0 sm:$0xff] }
 0x147   :  { %526 = vmatprep.mubr.f32.mxu0 %v385_v11 }
 0x148   :  { %527 = vmatmul.mubr.f32.vlgmr.msra.gmra.mxu0 %v384_v12 }
 0x149   :  { %811 = vmatpush3.msra.mxu0 %v699_v22 }
 0x14a   :  { %812 = vmatprep.subr.mxu0 %v714_v23 }
 0x14b   :  { %813 = vmatpush3.msra.mxu0 %v698_v24 }
 0x14c   :  { %814 = vmatprep.subr.mxu0 %v713_v25 }
 0x14d   :  { %815 = vmatpush3.msra.mxu0 %v697_v26 }
 0x14e   :  { %816 = vmatprep.subr.mxu0 %v712_v27 }
 0x14f   :  { %817 = vmatpush3.msra.mxu0 %v696_v28 }
 0x150   :  { %818 = vmatprep.subr.mxu0 %v711_v29 }
 0x151   :  { %819 = vmatpush3.msra.mxu0 %v695_v30 }
 0x152   :  { %820 = vmatprep.subr.mxu0 %v710_v31 }
 0x153   :  { %821 = vmatpush3.msra.mxu0 %v694_v32 }
 0x154   :  { %822 = vmatprep.subr.mxu0 %v709_v33 }
 0x155   :  { %823 = vmatpush3.msra.mxu0 %v693_v34 }
 0x156   :  { %824 = vmatprep.subr.mxu0 %v708_v35 }
 0x157   :  { %825 = vmatpush3.msra.mxu0 %v692_v36 }
 0x158   :  { %826 = vmatprep.subr.mxu0 %v707_v37 }
 0x159   :  { %827 = vmatpush3.msra.mxu0 %v691_v38 }
 0x15a   :  { %828 = vmatprep.subr.mxu0 %v706_v39 }
 0x15b   :  { %829 = vmatpush3.msra.mxu0 %v690_v40 }
 0x15c   :  { %830 = vmatprep.subr.mxu0 %v705_v41 }
 0x15d   :  { %831 = vmatpush3.msra.mxu0 %v689_v42 }
 0x15e   :  { %832 = vmatprep.subr.mxu0 %v704_v43 }
 0x15f   :  { %833 = vmatpush3.msra.mxu0 %v688_v44 }
 0x160   :  { %834 = vmatprep.subr.mxu0 %v703_v54 }
 0x161   :  { %835 = vmatpush3.msra.mxu0 %v687_v55 }
 0x162   :  { %836 = vmatprep.subr.mxu0 %v702_v56 }
 0x163   :  { %837 = vmatpush3.msra.mxu0 %v686_v57 }
 0x164   :  { %838 = vmatprep.subr.mxu0 %v701_v58 }
 0x165   :  { %839 = vmatpush3.msra.mxu0 %v685_v59 }
 0x166   :  { %840 = vmatprep.subr.mxu0 %v700_v60 }
 0x167   :  { %841 = vmatpush3.msra.mxu0 %v684_v61 }
 0x208   :  { %v528_v48 = vpop.f32.mrf.mxu0 }
 0x209   :  { %v529_v49 = vadd.f32 %v528_v48, %v455_v46 }
 0x20a   :  { %v530_v50 = vpop.f32.mrf.mxu0 }
 0x20b   :  { %v531_v51 = vadd.f32 %v530_v50, %v459_v47  ;;  %v533_v53 = vmax.f32 %v529_v49, 0.0 }
 0x20d   :  { %v534_v52 = vmax.f32 %v531_v51, 0.0 }
 0x20f   :  { %675 = vmatprep.mubr.f32.mxu1 %v534_v52 }
 0x210   :  { %676 = vmatmul.mubr.f32.vlgmr.msra.gmra.mxu1 %v533_v53 }
 0x2d0   :  { %v677_v3 = vpop.f32.mrf.mxu1 }
 0x2d1   :  { %v678_v4 = vadd.f32 %v677_v3, %v604_v1 }
 0x2d2   :  { %v679_v5 = vpop.f32.mrf.mxu1 }
 0x2d3   :  { %v680_v6 = vadd.f32 %v679_v5, %v608_v2  ;;  %v682_v8 = vmax.f32 %v678_v4, 0.0 }
 0x2d5   :  { %v683_v7 = vmax.f32 %v680_v6, 0.0 }
 0x2d7   :  { %787 = vmatprep.mubr.f32.mxu0 %v683_v7 }
 0x2d8   :  { %788 = vmatmul.mubr.f32.vlgmr.msra.gmra.mxu0 %v682_v8 }
 0x398   :  { %v842_v9 = vpop.f32.mrf.mxu0 }
 0x39a   :  { %v843_v11 = vpop.f32.mrf.mxu0 }
 0x39b   :  { %v844_v12 = vadd.f32 %v843_v11, %v842_v9 }
 0x39d   :  { %v790_v13 = vadd.f32 %v844_v12, %v808_v10 }
 0x39f   :  { %v809_v14 = vmul.f32 -1.442695, %v790_v13 }
 0x3a1   :  { %854 = vpow2.f32 %v809_v14 }
 0x3ae   :  { %v855_v62 = vpop.eup %854 }
 0x3af   :  { %v796_v0 = vadd.f32 1.0, %v855_v62 }
 0x3b1   :  { %856 = vrcp.f32 %v796_v0 }
 0x3be   :  { %v857_v15 = vpop.eup %856 }
 0x3bf   :  { %800 = vst.msk [vmem:[%s1081_s9] sm:$0xff] %vm799_vm0, %v857_v15 }
 0x3c0   :  { %805 = vsyncpa [#allocation3], 1 }
 0x3c1   :  { %806 = vsyncpa [#allocation5], 1 }
 0x3c2   :  { %807 = vsyncpa [#allocation8], 1 }

</bundles_post_ra>
